<compile_context>
chip_gen: v6e
topology: v6e:2x2x1
jax: 0.10.0
libtpu: 0.0.40
codegen_flags: <defaults>
</compile_context>

<pallas_src>
import jax
import jax.numpy as jnp
from jax import lax
from jax.experimental import pallas as pl
from jax.experimental.pallas import tpu as pltpu


def _gradient_loss_kernel(img1_ref, img2_ref, out_ref):
    x1 = img1_ref[...]          # (Bt, C, H, W), native dtype
    x2 = img2_ref[...]
    Bt, C, H, W = x1.shape

    # d = sum_c (x1 - x2): unrolled rank-3 accumulation (C is small & static).
    # bf16 inputs accumulate in bf16 (packed vregs on v6e/v7x), upcast once.
    acc_dtype = jnp.bfloat16 if x1.dtype == jnp.bfloat16 else jnp.float32
    d = None
    for c in range(C):
        dc = x1[:, c].astype(acc_dtype) - x2[:, c].astype(acc_dtype)
        d = dc if d is None else d + dc
    d = d.astype(jnp.float32)                                  # (Bt, H, W)

    # Fold batch into sublanes: (Bt*H, W).  Wrapper asserts H % 8 == 0 whenever
    # Bt > 1, so this is a trivial relayout.
    R = Bt * H
    d2 = d.reshape(R, W)

    # ---- W-direction taps (lane axis) ---------------------------------------
    #   wd[., j] = d[., j+2] - d[., j]                  ([-1, 0, 1] derivative)
    #   ws[., j] = d[., j] + 2 d[., j+1] + d[., j+2]    ([ 1, 2, 1] smoothing)
    use_col_roll = (W % 128 == 0)
    if use_col_roll:
        # Lane rolls keep shapes full-width / 128-lane-dense; wrapped columns
        # are zeroed by the (1, W) mask at the reduction.
        d_w1 = pltpu.roll(d2, W - 1, 1)   # d2[:, (j+1) % W]
        d_w2 = pltpu.roll(d2, W - 2, 1)   # d2[:, (j+2) % W]
        wd = d_w2 - d2
        ws = d2 + 2.0 * d_w1 + d_w2                            # (R, W)
        wo = W
    else:
        # Narrow images (row fits in one lane tile): plain in-tile slices.
        # TODO(synk): for W > 128 that is not a multiple of 128, pad W to a 128
        # multiple in the wrapper and reuse the roll path with a lane mask.
        wd = d2[:, 2:] - d2[:, :-2]
        ws = d2[:, :-2] + 2.0 * d2[:, 1:-1] + d2[:, 2:]        # (R, W-2)
        wo = W - 2

    # ---- H-direction taps (sublane axis) ------------------------------------
    #   gx[i] = wd[i] + 2 wd[i+1] + wd[i+2]    (Sobel-x, cross-correlation)
    #   gy[i] = ws[i+2] - ws[i]                (Sobel-y, cross-correlation)
    use_row_roll = (R % 8 == 0) or (Bt > 1)
    if use_row_roll:
        # Sublane rolls keep everything (R, wo)-shaped and (8,128)-aligned
        # (XLU slot, which has slack); wrapped rows are zeroed by the row mask.
        wd_1 = pltpu.roll(wd, R - 1, 0)   # wd[(i+1) % R]
        wd_2 = pltpu.roll(wd, R - 2, 0)   # wd[(i+2) % R]
        ws_2 = pltpu.roll(ws, R - 2, 0)
        gx = wd + 2.0 * wd_1 + wd_2                            # (R, wo)
        gy = ws_2 - ws
        ro = R
    else:
        # Bt == 1 with H not a multiple of 8: static sublane slices, no wrap.
        gx = wd[:-2, :] + 2.0 * wd[1:-1, :] + wd[2:, :]        # (R-2, wo)
        gy = ws[2:, :] - ws[:-2, :]
        ro = R - 2
    diff = jnp.abs(gx) + jnp.abs(gy)                           # (ro, wo)

    # ---- reduce to one partial sum ------------------------------------------
    # 1) (1, W) lane mask kills wrapped columns (roll path only): 1 mul/pixel.
    # 2) lane-reduce to per-row sums (XLU).
    # 3) (R, 1) row mask kills wrapped rows on the tiny per-row vector.
    if use_col_roll:
        col = lax.broadcasted_iota(jnp.int32, (1, wo), 1)
        diff = diff * (col < (W - 2)).astype(jnp.float32)
    row_sums = jnp.sum(diff, axis=1, keepdims=True)            # (ro, 1)
    if use_row_roll:
        row = lax.broadcasted_iota(jnp.int32, (ro, 1), 0)
        row_sums = row_sums * ((row % H) < (H - 2)).astype(jnp.float32)
    partial = jnp.sum(row_sums)

    # (8, 128)-aligned, lane-dense output tile so the out BlockSpec stays
    # tiling-legal for any number of grid steps; the wrapper reads [b, 0, 0].
    out_ref[...] = jnp.full((1, 8, 128), partial, dtype=jnp.float32)


def _vmem_budget_and_limit():
    """Generation-aware VMEM working-set budget and scoped-VMEM limit."""
    cap = 128 * 1024 * 1024
    try:
        info = pltpu.get_tpu_info()
        cap = int(getattr(info, "vmem_capacity_bytes", cap))
    except Exception:
        pass
    # ~24 MiB working-set target on v7x (64 MiB physical), ~48 MiB on v5e/v6e;
    # the scoped limit is raised above the default but leaves headroom for
    # compiler-internal scratch.
    budget = min(cap * 3 // 8, 48 * 1024 * 1024)
    limit = min(cap // 2, 64 * 1024 * 1024)
    return budget, max(limit, budget)


def _pick_block_b(B, C, H, W, in_itemsize, budget_bytes):
    """Largest batch tile whose true working set fits the VMEM budget:
    2 inputs x 2 pipeline buffers (input dtype) plus ~10 full-size f32
    intermediates (d, rolled taps, wd/ws, gx/gy/diff) in the kernel body."""
    if H % 8 != 0:
        return 1  # keep the in-kernel batch->sublane fold a trivial relayout
    per_b = 4 * C * H * W * in_itemsize + 10 * H * W * 4
    bb = max(1, min(B, budget_bytes // max(per_b, 1)))
    if B >= 2:
        bb = min(bb, B // 2)  # >= 2 grid steps so v7x's 2nd TensorCore has work
    while B % bb:
        bb -= 1
    return max(bb, 1)


def gradient_loss(img1, img2, *, block_b=None):
    """Sobel gradient L1 loss (channel_mean=True), matching the PyTorch module."""
    assert img1.shape == img2.shape and img1.dtype == img2.dtype
    B, C, H, W = img1.shape
    assert H >= 3 and W >= 3, "Sobel needs at least 3x3 spatial dims"
    # TODO(synk): for single images whose per-block working set exceeds the VMEM
    # budget, tile H with a 2-row halo (manual DMA via memory_space=pl.ANY)
    # instead of whole-image blocks.

    budget, vmem_limit = _vmem_budget_and_limit()
    if block_b is None:
        block_b = _pick_block_b(B, C, H, W, jnp.dtype(img1.dtype).itemsize, budget)
    assert B % block_b == 0
    assert block_b == 1 or H % 8 == 0, \
        "block_b > 1 requires H % 8 == 0 (batch->sublane fold must stay trivial)"
    nb = B // block_b

    partials = pl.pallas_call(
        _gradient_loss_kernel,
        out_shape=jax.ShapeDtypeStruct((nb, 8, 128), jnp.float32),
        grid_spec=pltpu.PrefetchScalarGridSpec(
            num_scalar_prefetch=0,
            grid=(nb,),
            in_specs=[
                pl.BlockSpec((block_b, C, H, W), lambda b: (b, 0, 0, 0)),
                pl.BlockSpec((block_b, C, H, W), lambda b: (b, 0, 0, 0)),
            ],
            out_specs=pl.BlockSpec((1, 8, 128), lambda b: (b, 0, 0)),
        ),
        compiler_params=pltpu.CompilerParams(
            dimension_semantics=("parallel",),
            vmem_limit_bytes=int(vmem_limit)),
    )(img1, img2)

    ho, wo = H - 2, W - 2
    # Fold the channel-mean 1/C and the final spatial/batch mean into one scale.
    scale = 1.0 / float(C * B * ho * wo)
    return jnp.sum(partials[:, 0, 0]) * jnp.float32(scale)


def _gradient_loss_ref(img1, img2):
    """Pure-JAX reference mirroring the PyTorch module (mean over channels,
    then valid 3x3 cross-correlation with Sobel-x/y, then |.| diff and mean)."""
    kx = jnp.array([[-1., 0., 1.], [-2., 0., 2.], [-1., 0., 1.]], jnp.float32)
    ky = jnp.array([[-1., -2., -1.], [0., 0., 0.], [1., 2., 1.]], jnp.float32)

    def grads(img):
        m = jnp.mean(img.astype(jnp.float32), axis=1)        # (B, H, W)
        B, H, W = m.shape
        ho, wo = H - 2, W - 2
        gx = jnp.zeros((B, ho, wo), jnp.float32)
        gy = jnp.zeros((B, ho, wo), jnp.float32)
        for u in range(3):
            for v in range(3):
                s = m[:, u:u + ho, v:v + wo]
                gx = gx + kx[u, v] * s
                gy = gy + ky[u, v] * s
        return gx, gy

    gx1, gy1 = grads(img1)
    gx2, gy2 = grads(img2)
    return jnp.mean(jnp.abs(gx1 - gx2) + jnp.abs(gy1 - gy2))


if __name__ == "__main__":
    key = jax.random.PRNGKey(0)
    k1, k2 = jax.random.split(key)
    B, C, H, W = 2, 4, 16, 16
    img1 = jax.random.normal(k1, (B, C, H, W), dtype=jnp.float32)
    img2 = jax.random.normal(k2, (B, C, H, W), dtype=jnp.float32)

    loss = jax.block_until_ready(gradient_loss(img1, img2))
    ref = jax.block_until_ready(_gradient_loss_ref(img1, img2))

    assert jnp.allclose(loss, ref, rtol=1e-5, atol=1e-5), (loss, ref)
    print("KERNEL_OK")
</pallas_src>

<mosaic_0001>
module attributes {stable_mosaic.version = 11 : i64} {
  func.func @_gradient_loss_kernel(%arg0: i32, %arg1: memref<1x4x16x16xf32, #tpu.memory_space<vmem>>, %arg2: memref<1x4x16x16xf32, #tpu.memory_space<vmem>>, %arg3: memref<1x8x128xf32, #tpu.memory_space<vmem>>) attributes {dimension_semantics = [#tpu.dimension_semantics<parallel>], iteration_bounds = array<i64: 2>, scalar_prefetch = 0 : i64, scratch_operands = 0 : i64, tpu.core_type = #tpu.core_type<tc>, window_params = [{transform_indices = @transform_0, window_bounds = array<i64: 1, 4, 16, 16>}, {transform_indices = @transform_1, window_bounds = array<i64: 1, 4, 16, 16>}, {transform_indices = @transform_2, window_bounds = array<i64: 1, 8, 128>}]} {
    %c0 = arith.constant 0 : index
    %c0_0 = arith.constant 0 : index
    %c0_1 = arith.constant 0 : index
    %c0_2 = arith.constant 0 : index
    %0 = vector.load %arg1[%c0, %c0_0, %c0_1, %c0_2] : memref<1x4x16x16xf32, #tpu.memory_space<vmem>>, vector<1x4x16x16xf32>
    %c0_3 = arith.constant 0 : index
    %c0_4 = arith.constant 0 : index
    %c0_5 = arith.constant 0 : index
    %c0_6 = arith.constant 0 : index
    %1 = vector.load %arg2[%c0_3, %c0_4, %c0_5, %c0_6] : memref<1x4x16x16xf32, #tpu.memory_space<vmem>>, vector<1x4x16x16xf32>
    %2 = vector.extract_strided_slice %0 {offsets = [0, 0, 0, 0], sizes = [1, 1, 16, 16], strides = [1, 1, 1, 1]} : vector<1x4x16x16xf32> to vector<1x1x16x16xf32>
    %3 = vector.shape_cast %2 : vector<1x1x16x16xf32> to vector<1x16x16xf32>
    %4 = vector.extract_strided_slice %1 {offsets = [0, 0, 0, 0], sizes = [1, 1, 16, 16], strides = [1, 1, 1, 1]} : vector<1x4x16x16xf32> to vector<1x1x16x16xf32>
    %5 = vector.shape_cast %4 : vector<1x1x16x16xf32> to vector<1x16x16xf32>
    %6 = arith.subf %3, %5 : vector<1x16x16xf32>
    %7 = vector.extract_strided_slice %0 {offsets = [0, 1, 0, 0], sizes = [1, 1, 16, 16], strides = [1, 1, 1, 1]} : vector<1x4x16x16xf32> to vector<1x1x16x16xf32>
    %8 = vector.shape_cast %7 : vector<1x1x16x16xf32> to vector<1x16x16xf32>
    %9 = vector.extract_strided_slice %1 {offsets = [0, 1, 0, 0], sizes = [1, 1, 16, 16], strides = [1, 1, 1, 1]} : vector<1x4x16x16xf32> to vector<1x1x16x16xf32>
    %10 = vector.shape_cast %9 : vector<1x1x16x16xf32> to vector<1x16x16xf32>
    %11 = arith.subf %8, %10 : vector<1x16x16xf32>
    %12 = arith.addf %6, %11 : vector<1x16x16xf32>
    %13 = vector.extract_strided_slice %0 {offsets = [0, 2, 0, 0], sizes = [1, 1, 16, 16], strides = [1, 1, 1, 1]} : vector<1x4x16x16xf32> to vector<1x1x16x16xf32>
    %14 = vector.shape_cast %13 : vector<1x1x16x16xf32> to vector<1x16x16xf32>
    %15 = vector.extract_strided_slice %1 {offsets = [0, 2, 0, 0], sizes = [1, 1, 16, 16], strides = [1, 1, 1, 1]} : vector<1x4x16x16xf32> to vector<1x1x16x16xf32>
    %16 = vector.shape_cast %15 : vector<1x1x16x16xf32> to vector<1x16x16xf32>
    %17 = arith.subf %14, %16 : vector<1x16x16xf32>
    %18 = arith.addf %12, %17 : vector<1x16x16xf32>
    %19 = vector.extract_strided_slice %0 {offsets = [0, 3, 0, 0], sizes = [1, 1, 16, 16], strides = [1, 1, 1, 1]} : vector<1x4x16x16xf32> to vector<1x1x16x16xf32>
    %20 = vector.shape_cast %19 : vector<1x1x16x16xf32> to vector<1x16x16xf32>
    %21 = vector.extract_strided_slice %1 {offsets = [0, 3, 0, 0], sizes = [1, 1, 16, 16], strides = [1, 1, 1, 1]} : vector<1x4x16x16xf32> to vector<1x1x16x16xf32>
    %22 = vector.shape_cast %21 : vector<1x1x16x16xf32> to vector<1x16x16xf32>
    %23 = arith.subf %20, %22 : vector<1x16x16xf32>
    %24 = arith.addf %18, %23 : vector<1x16x16xf32>
    %25 = vector.shape_cast %24 : vector<1x16x16xf32> to vector<16x16xf32>
    %26 = vector.extract_strided_slice %25 {offsets = [0, 2], sizes = [16, 14], strides = [1, 1]} : vector<16x16xf32> to vector<16x14xf32>
    %27 = vector.extract_strided_slice %25 {offsets = [0, 0], sizes = [16, 14], strides = [1, 1]} : vector<16x16xf32> to vector<16x14xf32>
    %28 = arith.subf %26, %27 : vector<16x14xf32>
    %29 = vector.extract_strided_slice %25 {offsets = [0, 0], sizes = [16, 14], strides = [1, 1]} : vector<16x16xf32> to vector<16x14xf32>
    %30 = vector.extract_strided_slice %25 {offsets = [0, 1], sizes = [16, 14], strides = [1, 1]} : vector<16x16xf32> to vector<16x14xf32>
    %cst = arith.constant 2.000000e+00 : f32
    %31 = vector.broadcast %cst : f32 to vector<16x14xf32>
    %32 = arith.mulf %31, %30 : vector<16x14xf32>
    %33 = arith.addf %29, %32 : vector<16x14xf32>
    %34 = vector.extract_strided_slice %25 {offsets = [0, 2], sizes = [16, 14], strides = [1, 1]} : vector<16x16xf32> to vector<16x14xf32>
    %35 = arith.addf %33, %34 : vector<16x14xf32>
    %c15_i32 = arith.constant 15 : i32
    %36 = tpu.dynamic_rotate %28 by %c15_i32 dim 0 : vector<16x14xf32>, i32 -> vector<16x14xf32>
    %c14_i32 = arith.constant 14 : i32
    %37 = tpu.dynamic_rotate %28 by %c14_i32 dim 0 : vector<16x14xf32>, i32 -> vector<16x14xf32>
    %c14_i32_7 = arith.constant 14 : i32
    %38 = tpu.dynamic_rotate %35 by %c14_i32_7 dim 0 : vector<16x14xf32>, i32 -> vector<16x14xf32>
    %cst_8 = arith.constant 2.000000e+00 : f32
    %39 = vector.broadcast %cst_8 : f32 to vector<16x14xf32>
    %40 = arith.mulf %39, %36 : vector<16x14xf32>
    %41 = arith.addf %28, %40 : vector<16x14xf32>
    %42 = arith.addf %41, %37 : vector<16x14xf32>
    %43 = arith.subf %38, %35 : vector<16x14xf32>
    %44 = math.absf %42 : vector<16x14xf32>
    %45 = math.absf %43 : vector<16x14xf32>
    %46 = arith.addf %44, %45 : vector<16x14xf32>
    %cst_9 = arith.constant dense<0.000000e+00> : vector<16xf32>
    %47 = vector.multi_reduction <add>, %46, %cst_9 [1] : vector<16x14xf32> to vector<16xf32>
    %48 = vector.shape_cast %47 : vector<16xf32> to vector<16x1xf32>
    %49 = tpu.iota {dimensions = array<i32: 0>} : vector<16x1xi32>
    %c16_i32 = arith.constant 16 : i32
    %c0_i32 = arith.constant 0 : i32
    %50 = arith.cmpi eq, %c16_i32, %c0_i32 : i32
    %c1_i32 = arith.constant 1 : i32
    %51 = arith.select %50, %c1_i32, %c16_i32 : i32
    %52 = vector.broadcast %51 : i32 to vector<16x1xi32>
    %53 = arith.remsi %49, %52 : vector<16x1xi32>
    %c0_i32_10 = arith.constant 0 : i32
    %54 = vector.broadcast %c0_i32_10 : i32 to vector<16x1xi32>
    %55 = arith.cmpi ne, %53, %54 : vector<16x1xi32>
    %c0_i32_11 = arith.constant 0 : i32
    %56 = vector.broadcast %c0_i32_11 : i32 to vector<16x1xi32>
    %57 = arith.cmpi slt, %53, %56 : vector<16x1xi32>
    %c0_i32_12 = arith.constant 0 : i32
    %58 = arith.cmpi slt, %51, %c0_i32_12 : i32
    %59 = vector.broadcast %58 : i1 to vector<16x1xi1>
    %60 = vector.broadcast %59 : vector<16x1xi1> to vector<16x1xi1>
    %61 = arith.xori %57, %60 : vector<16x1xi1>
    %62 = arith.andi %61, %55 : vector<16x1xi1>
    %63 = vector.broadcast %51 : i32 to vector<16x1xi32>
    %64 = arith.addi %53, %63 : vector<16x1xi32>
    %65 = arith.select %62, %64, %53 : vector<16x1xi1>, vector<16x1xi32>
    %c14_i32_13 = arith.constant 14 : i32
    %66 = vector.broadcast %c14_i32_13 : i32 to vector<16x1xi32>
    %67 = arith.cmpi slt, %65, %66 : vector<16x1xi32>
    %68 = arith.extui %67 : vector<16x1xi1> to vector<16x1xi32>
    %69 = arith.sitofp %68 : vector<16x1xi32> to vector<16x1xf32>
    %70 = arith.mulf %48, %69 : vector<16x1xf32>
    %71 = vector.shape_cast %70 : vector<16x1xf32> to vector<1x16x1xf32>
    %cst_14 = arith.constant dense<0.000000e+00> : vector<1xf32>
    %72 = vector.multi_reduction <add>, %71, %cst_14 [1, 2] : vector<1x16x1xf32> to vector<1xf32>
    %73 = vector.shape_cast %72 : vector<1xf32> to vector<1x1x1xf32>
    %74 = vector.extract %73[0, 0, 0] : f32 from vector<1x1x1xf32>
    %75 = vector.broadcast %74 : f32 to vector<1x8x128xf32>
    %c0_15 = arith.constant 0 : index
    %c0_16 = arith.constant 0 : index
    %c0_17 = arith.constant 0 : index
    %76 = vector.load %arg3[%c0_15, %c0_16, %c0_17] : memref<1x8x128xf32, #tpu.memory_space<vmem>>, vector<1x8x128xf32>
    tpu.vector_store %arg3[%c0_15, %c0_16, %c0_17], %75 {strides = array<i32>} : memref<1x8x128xf32, #tpu.memory_space<vmem>>, vector<1x8x128xf32>,
    return
  }
  func.func @transform_0(%arg0: i32) -> (i32, i32, i32, i32) {
    %c0_i32 = arith.constant 0 : i32
    %c0_i32_0 = arith.constant 0 : i32
    %c0_i32_1 = arith.constant 0 : i32
    %c0_i32_2 = arith.constant 0 : i32
    return %arg0, %c0_i32, %c0_i32_0, %c0_i32_1 : i32, i32, i32, i32
  }
  func.func @transform_1(%arg0: i32) -> (i32, i32, i32, i32) {
    %c0_i32 = arith.constant 0 : i32
    %c0_i32_0 = arith.constant 0 : i32
    %c0_i32_1 = arith.constant 0 : i32
    %c0_i32_2 = arith.constant 0 : i32
    return %arg0, %c0_i32, %c0_i32_0, %c0_i32_1 : i32, i32, i32, i32
  }
  func.func @transform_2(%arg0: i32) -> (i32, i32, i32) {
    %c0_i32 = arith.constant 0 : i32
    %c0_i32_0 = arith.constant 0 : i32
    %c0_i32_1 = arith.constant 0 : i32
    return %arg0, %c0_i32, %c0_i32_0 : i32, i32, i32
  }
}

</mosaic_0001>

<bundles_post_ra>
// kernel: tpu_custom_call.1
= control target key start
LH: loop header
LB: loop body
LE: loop exit
PB: predicated region body
PF: predicated region fallthrough
CT: control target
= control target key end

     0   :  { %7 = vsyncpa [#allocation3], 0  ;;  %s948_s0 = inlined_call_operand.hbm [shape: f32[2,4,16,16], index: 0, kind: input, shape index: {}]   ;;  %s949_s1 = inlined_call_operand.hbm [shape: f32[2,4,16,16], index: 1, kind: input, shape index: {}]   ;;  %s950_s2 = inlined_call_operand.hbm [shape: f32[2,8,128], index: 2, kind: output, shape index: {}]  }
   0x1   :  { %9 = vsyncpa [#allocation3 + $0x1], 0 }
   0x2   :  { %10 = vsyncpa [#allocation6], 0 }
   0x3   :  { %12 = vsyncpa [#allocation6 + $0x1], 0 }
   0x4   :  { %13 = vsyncpa [#allocation4], 0 }
   0x5   :  { %15 = vsyncpa [#allocation4 + $0x1], 0  ;;  %s723_s9 = smov 0   ;;  %s725_s10 = smov 0  }
   0x6   :  { %s727_s11 = smov 0   ;;  %s729_s12 = smov 0  }
   0x7 LB: > { %s744_s13 = sadd.s32 4294967295, %s697_s12   ;;  %s494_s14 = sadd.s32 4294967294, %s697_s12   ;;  %s697_s12 = sphi %s729_s12, %s966_s12   ;;  %s693_s11 = sphi %s727_s11, %s965_s11   ;;  %s689_s10 = sphi %s725_s10, %s964_s10   ;;  %s685_s9 = sphi %s723_s9, %s963_s9  }
   0x8   : > { %s748_s15 = sadd.s32 1, %s697_s12   ;;  %s28_s16 = sadd.s32 1, %s693_s11 }
   0x9   : > { %s25_s17 = ssub.s32 %s697_s12, %s748_s15  ;;  %p35_p0 = scmp.ne.s32.totalorder %s693_s11, %s689_s10 }
   0xa   : > { %p26_p1 = scmp.eq.s32.totalorder %s25_s17, 0  ;;  %p36_p2 = scmp.eq.s32.totalorder %s697_s12, 0 }
   0xb   : > { %p41_p3 = scmp.ne.s32.totalorder %s689_s10, %s685_s9  ;;  %p42_p4 = scmp.eq.s32.totalorder %s744_s13, 0 }
   0xc   : > { %s760_s18 = scalar_select %p26_p1, %s693_s11, %s28_s16  }
   0xd   : > { %p762_p5 = por %p36_p2, %p35_p0  ;;  %p766_p6 = por %p42_p4, %p41_p3 }
   0xe   : > { %p91_p7 = scmp.eq.s32.totalorder %s744_s13, 1  ;;  %p97_p8 = scmp.eq.s32.totalorder %s494_s14, 1 }
   0xf   : > { %s954_s20 = scalar_select %p766_p6, 1, 0 }
  0x10   : > { %p533_p10 = scmp.lt.s32.totalorder %s697_s12, 2  ;;  %p773_p11 = por %p91_p7, %p35_p0 }
  0x11   : > { %p777_p12 = por %p97_p8, %p41_p3  ;;  %s782_s23 = sand.u32 1, %s693_s11  }
  0x12   : > { %s955_s21 = scalar_select %p773_p11, 1, 0 }
  0x13   : > { %s956_s22 = scalar_select %p777_p12, 1, 0 }
  0x14   : > { %s512_s24 = sshll.u32 %s697_s12, 10  ;;  %s497_s25 = sshll.u32 %s782_s23, 6 }
  0x15   : > { %s791_s28 = scalar_lea.hbm %s948_s0, %s512_s24  ;;  %s121_s29 = scalar_lea.vmem [#allocation2], %s497_s25 }
  0x16   : > { %s128_s30 = sshll.u32 %s121_s29, 4  ;;  %p797_p13 = pnand %p533_p10, %p762_p5  ;;  %s801_s30 = int_to_ptr.vmem [resolvable:$true] %s128_s30 }
  0x17   : > { %s118_s4 = scalar_lea.sflag [#allocation3], %s782_s23  ;;  %s573_s5 = scalar_lea.hbm %s791_s28, 1024 }
  0x18   : > { %p574_p0 = scmp.ne.s32.totalorder %s791_s28, %s573_s5  ;;  %p575_p1 = pneg %p797_p13 }
  0x19   : > { %s578_s8 = scalar_lea.hbm %s948_s0, 2048  ;;  %p579_p4 = scmp.lt.s32.totalorder %s791_s28, %s948_s0 }
  0x1a   : > { %p576_p2 = pnand %p575_p1, %p574_p0  ;;  %p580_p5 = scmp.lt.s32.totalorder %s578_s8, %s573_s5 }
  0x1c   : > { %p577_p3 = pneg %p576_p2  ;;  %p581_p7 = por %p580_p5, %p579_p4 }
  0x1e   : > { %p582_p8 = pnand %p581_p7, %p577_p3 }
  0x20   : > { %585 = shalt.err (!%p582_p8)
}
  0x21   : > { %s586_s17 = scalar_lea.vmem %s801_s30, 1024  ;;  %s699_s19 = smov [#allocation2]  }
  0x22   : > { %p587_p10 = scmp.ne.s32.totalorder %s801_s30, %s586_s17  ;;  %s591_s26 = sshll.u32 %s699_s19, 4  ;;  %s592_s26 = int_to_ptr.vmem [resolvable:$false] %s591_s26 }
  0x23   : > { %s593_s27 = scalar_lea.vmem %s592_s26, 2048  ;;  %p594_p9 = scmp.lt.s32.totalorder %s801_s30, %s592_s26 }
  0x24   : > { %p589_p0 = pnand %p587_p10, %p575_p1  ;;  %p595_p12 = scmp.lt.s32.totalorder %s593_s27, %s586_s17 }
  0x26   : > { %p590_p2 = pneg %p589_p0  ;;  %p596_p11 = por %p595_p12, %p594_p9 }
  0x28   : > { %p597_p4 = pnand %p596_p11, %p590_p2 }
  0x2a   : > { %600 = shalt.err (!%p597_p4)
}
  0x2b   : > { %s700_s29 = smov 128   ;;  %s701_s5 = smov 8  }
  0x2c   : > { %525 = dma.hbm_to_vmem [thread:$0]  (!%p797_p13), %s791_s28, 1024, %s801_s30, %s118_s4, %s700_s29, %s700_s29, %s701_s5  }
  0x2d   : > { %p503_p9 = scmp.ge.s32.totalorder %s697_s12, 1  ;;  %p157_p11 = scmp.lt.s32.totalorder %s697_s12, 3 }
  0x2e   : > { %s844_s14 = scalar_lea.hbm %s949_s1, %s512_s24  ;;  %s142_s16 = scalar_lea.vmem [#allocation5], %s497_s25 }
  0x2f   : > { %p835_p12 = pnand %p503_p9, %p157_p11  ;;  %s149_s17 = sshll.u32 %s142_s16, 4  ;;  %s848_s17 = int_to_ptr.vmem [resolvable:$true] %s149_s17 }
  0x30   : > { %s139_s28 = scalar_lea.sflag [#allocation6], %s782_s23  ;;  %s601_s30 = scalar_lea.hbm %s844_s14, 1024 }
  0x31   : > { %p602_p3 = scmp.ne.s32.totalorder %s844_s14, %s601_s30  ;;  %s606_s24 = scalar_lea.hbm %s949_s1, 2048 }
  0x32   : > { %p607_p8 = scmp.lt.s32.totalorder %s844_s14, %s949_s1  ;;  %p608_p10 = scmp.lt.s32.totalorder %s606_s24, %s601_s30 }
  0x33   : > { %p604_p5 = pnand %p602_p3, %p575_p1 }
  0x34   : > { %p609_p0 = por %p608_p10, %p607_p8 }
  0x35   : > { %p605_p7 = pneg %p604_p5 }
  0x37   : > { %p610_p2 = pnand %p609_p0, %p605_p7 }
  0x39   : > { %613 = shalt.err (!%p610_p2)
}
  0x3a   : > { %s614_s23 = scalar_lea.vmem %s848_s17, 1024  ;;  %s702_s25 = smov [#allocation5]  }
  0x3b   : > { %p615_p4 = scmp.ne.s32.totalorder %s848_s17, %s614_s23  ;;  %s619_s7 = sshll.u32 %s702_s25, 4  ;;  %s620_s7 = int_to_ptr.vmem [resolvable:$false] %s619_s7 }
  0x3c   : > { %s621_s8 = scalar_lea.vmem %s620_s7, 2048  ;;  %p622_p3 = scmp.lt.s32.totalorder %s848_s17, %s620_s7 }
  0x3d   : > { %p617_p9 = pnand %p615_p4, %p575_p1  ;;  %p623_p5 = scmp.lt.s32.totalorder %s621_s8, %s614_s23 }
  0x3f   : > { %p618_p11 = pneg %p617_p9  ;;  %p624_p6 = por %p623_p5, %p622_p3 }
  0x41   : > { %p625_p8 = pnand %p624_p6, %p618_p11 }
  0x43   : > { %628 = shalt.err (!%p625_p8)
}
  0x44   : > { %528 = dma.hbm_to_vmem [thread:$0]  (!%p797_p13), %s844_s14, 1024, %s848_s17, %s139_s28, %s700_s29, %s700_s29, %s701_s5  }
  0x45   : > { %161 = sbr.rel (%p835_p12) target bundleno = 927 (0x39f), region = 28  ;;  %s879_s16 = sand.u32 (!%p835_p12), 1, %s689_s10  }
  0x46   : > { %s504_s30 = sshll.u32 (!%p835_p12), %s879_s16, 6  ;;  %s164_s4 = scalar_lea.sflag (!%p835_p12), [#allocation3], %s879_s16 }
  0x47   : > { %s167_s19 = scalar_lea.vmem (!%p835_p12), [#allocation2], %s504_s30  ;;  %p959_p6 = scmp.ne.s32.totalorder (!%p835_p12), %s954_s20, 0 }
  0x4a   : > { %672 = dma.done.wait (%p959_p6), %s164_s4, 1024  }
  0x4b   : > { %674 = vsyncadd (%p959_p6), %s164_s4, 4294966272  ;;  %s173_s3 = scalar_lea.sflag [#allocation6], %s879_s16  ;;  %s176_s29 = scalar_lea.vmem [#allocation5], %s504_s30 }
  0x4c   : > { %676 = dma.done.wait (%p959_p6), %s173_s3, 1024  }
  0x4d   : > { %678 = vsyncadd (%p959_p6), %s173_s3, 4294966272  ;;  %v202_v0 = vld [vmem:[%s167_s19] sm:$0xff]  ;;  %v204_v1 = vld [vmem:[%s167_s19 + $0x10] sm:$0xff]  ;;  %s703_s20 = smov 2   ;;  %s704_s5 = smov 127   ;;  %v272_v37 = vlaneseq  ;;  %vm332_vm2 = vcmask 113664  }
  0x4e   : > { %v206_v2 = vld [vmem:[%s167_s19 + $0x20] sm:$0xff]  ;;  %v208_v3 = vld [vmem:[%s167_s19 + $0x30] sm:$0xff]  ;;  %v203_v10 = vld [vmem:[%s167_s19 + $0x8] sm:$0xff]  ;;  %s705_s6 = smov 126   ;;  %vm372_vm4 = vcmask 7168   ;;  %s506_s14 = sshll.u32 %s879_s16, 3 }
  0x4f   : > { %v210_v4 = vld [vmem:[%s176_s29] sm:$0xff]  ;;  %v212_v5 = vld [vmem:[%s176_s29 + $0x10] sm:$0xff]  ;;  %v205_v12 = vld [vmem:[%s167_s19 + $0x18] sm:$0xff]  ;;  %v273_v40 = vshrl.u32 %v272_v37, 7  ;;  %s201_s17 = scalar_lea.vmem [#allocation7], %s506_s14  ;;  %s509_s24 = sshll.u32 %s744_s13, 7 }
  0x50   : > { %v214_v6 = vld [vmem:[%s176_s29 + $0x20] sm:$0xff]  ;;  %v216_v7 = vld [vmem:[%s176_s29 + $0x30] sm:$0xff]  ;;  %v218_v8 = vsub.f32 %v202_v0, %v210_v4  ;;  %v220_v9 = vsub.f32 %v204_v1, %v212_v5  ;;  %v207_v13 = vld [vmem:[%s167_s19 + $0x28] sm:$0xff]  ;;  %s401_s28 = sshll.u32 %s201_s17, 4  ;;  %s399_s25 = scalar_lea.hbm %s950_s2, %s509_s24  ;;  %s908_s28 = int_to_ptr.vmem [resolvable:$true] %s401_s28 }
  0x51   : > { %v224_v11 = vsub.f32 %v206_v2, %v214_v6  ;;  %v209_v14 = vld [vmem:[%s167_s19 + $0x38] sm:$0xff]  ;;  %v228_v16 = vsub.f32 %v208_v3, %v216_v7  ;;  %v211_v17 = vld [vmem:[%s176_s29 + $0x8] sm:$0xff]  ;;  %vm274_vm0 = vcmp.lt.s32.totalorder %v273_v40, 7  ;;  %vm279_vm1 = vcmp.lt.s32.totalorder %v273_v40, 6  ;;  %s388_s7 = scalar_lea.sflag [#allocation4], %s879_s16  ;;  %s629_s8 = scalar_lea.vmem %s908_s28, 128 }
  0x52   : > { %v222_v15 = vadd.f32 %v220_v9, %v218_v8  ;;  %v213_v18 = vld [vmem:[%s176_s29 + $0x18] sm:$0xff]  ;;  %v215_v19 = vld [vmem:[%s176_s29 + $0x28] sm:$0xff]  ;;  %v219_v21 = vsub.f32 %v203_v10, %v211_v17  ;;  %p630_p13 = scmp.ne.s32.totalorder %s908_s28, %s629_s8  ;;  %p960_p1 = scmp.ne.s32.totalorder %s955_s21, 0 }
  0x53   : > { %v217_v20 = vld [vmem:[%s176_s29 + $0x38] sm:$0xff]  ;;  %v221_v22 = vsub.f32 %v205_v12, %v213_v18  ;;  %v225_v23 = vsub.f32 %v207_v13, %v215_v19  ;;  %s707_s30 = smov [#allocation7]  }
  0x54   : > { %v226_v24 = vadd.f32 %v224_v11, %v222_v15  ;;  %v229_v26 = vsub.f32 %v209_v14, %v217_v20  ;;  %v339_v20 = vadd.s32 8, %v273_v40  ;;  %p631_p12 = pnand %p630_p13, %p960_p1  ;;  %s633_s13 = sshll.u32 %s707_s30, 4  ;;  %s634_s13 = int_to_ptr.vmem [resolvable:$false] %s633_s13 }
  0x55   : > { %v223_v25 = vadd.f32 %v221_v22, %v219_v21  ;;  %v706_v22 = vmov 0.0   ;;  %s635_s4 = scalar_lea.vmem %s634_s13, 256  ;;  %p636_p10 = scmp.lt.s32.totalorder %s908_s28, %s634_s13 }
  0x56   : > { %v230_v27 = vadd.f32 %v228_v16, %v226_v24  ;;  %v351_v21 = vand.u32 15, %v339_v20  ;;  %p632_p7 = pneg %p631_p12  ;;  %p637_p0 = scmp.lt.s32.totalorder %s635_s4, %s629_s8 }
  0x57   : > { %v227_v28 = vadd.f32 %v225_v23, %v223_v25 }
  0x58   : > { %234 = vrot.lane.b32.xlu0 %v230_v27, %s703_s20  ;;  %v242_v29 = vmul.f32 2.0, %v230_v27  ;;  %vm365_vm3 = vcmp.lt.s32.totalorder %v351_v21, 14  ;;  %p638_p2 = por %p637_p0, %p636_p10 }
  0x59   : > { %v231_v30 = vadd.f32 %v229_v26, %v227_v28  ;;  %v507_v23 = vsel %vm365_vm3, 1.0, %v706_v22 }
  0x5a   : > { %246 = vrot.lane.b32.xlu1 %v242_v29, %s704_s5  ;;  %p639_p4 = pnand %p638_p2, %p632_p7 }
  0x5b   : > { %v243_v31 = vmul.f32 2.0, %v231_v30 }
  0x5c   : > { %236 = vrot.lane.b32.xlu0 %v231_v30, %s703_s20 }
  0x5e   : > { %248 = vrot.lane.b32.xlu1 %v243_v31, %s704_s5 }
  0xca   : > { %v235_v32 = vpop.permute.xlu0 %234 }
  0xcb   : > { %v240_v33 = vsub.f32 %v230_v27, %v235_v32 }
  0xcc   : > { %v247_v36 = vpop.permute.xlu1 %246 }
  0xcd   : > { %264 = vrot.lane.b32.xlu0 %v240_v33, %s705_s6  ;;  %v252_v43 = vadd.f32 %v247_v36, %v230_v27 }
  0xce   : > { %v237_v34 = vpop.permute.xlu0 %236 }
  0xcf   : > { %v241_v35 = vsub.f32 %v231_v30, %v237_v34 }
  0xd0   : > { %v249_v38 = vpop.permute.xlu1 %248 }
  0xd1   : > { %254 = vrot.lane.b32.xlu0 %v230_v27, %s705_s6  ;;  %266 = vrot.lane.b32.xlu1 %v241_v35, %s705_s6  ;;  %v253_v46 = vadd.f32 %v249_v38, %v231_v30 }
  0xd5   : > { %256 = vrot.lane.b32.xlu1 %v231_v30, %s705_s6 }
 0x13f   : > { %v265_v39 = vpop.permute.xlu0 %264 }
 0x140   : > { %v270_v44 = vrot.slane %v265_v39, 1  ;;  %v277_v55 = vrot.slane %v265_v39, 2 }
 0x143   : > { %v255_v41 = vpop.permute.xlu0 %254  ;;  %v267_v42 = vpop.permute.xlu1 %266 }
 0x144   : > { %v271_v45 = vrot.slane %v267_v42, 1  ;;  %v260_v47 = vadd.f32 %v255_v41, %v252_v43  ;;  %v278_v53 = vrot.slane %v267_v42, 2 }
 0x146   : > { %v276_v48 = vsel %vm274_vm0, %v271_v45, %v270_v44  ;;  %v275_v49 = vsel %vm274_vm0, %v270_v44, %v271_v45  ;;  %v282_v56 = vrot.slane %v260_v47, 2  ;;  %v281_v59 = vsel %vm279_vm1, %v278_v53, %v277_v55 }
 0x147   : > { %v257_v50 = vpop.permute.xlu1 %256  ;;  %v287_v51 = vmul.f32 2.0, %v276_v48  ;;  %v286_v52 = vmul.f32 2.0, %v275_v49  ;;  %v280_v60 = vsel %vm279_vm1, %v277_v55, %v278_v53 }
 0x148   : > { %v261_v54 = vadd.f32 %v257_v50, %v253_v46 }
 0x149   : > { %292 = vrot.lane.b32.xlu0 %v287_v51, %s703_s20  ;;  %290 = vrot.lane.b32.xlu1 %v286_v52, %s703_s20 }
 0x14a   : > { %v283_v57 = vrot.slane %v261_v54, 2 }
 0x14c   : > { %v285_v58 = vsel %vm279_vm1, %v283_v57, %v282_v56  ;;  %v284_v61 = vsel %vm279_vm1, %v282_v56, %v283_v57 }
 0x14d   : > { %v309_v62 = vsub.f32 %v285_v58, %v261_v54  ;;  %302 = vrot.lane.b32.xlu0 %v281_v59, %s703_s20  ;;  %300 = vrot.lane.b32.xlu1 %v280_v60, %s703_s20  ;;  %v308_v63 = vsub.f32 %v284_v61, %v260_v47 }
 0x14f   : > { %v313_v0 = vand.u32 2147483647, %v309_v62  ;;  %v312_v1 = vand.u32 2147483647, %v308_v63 }
 0x151   : > { %318 = vrot.lane.b32.xlu0 %v313_v0, %s703_s20  ;;  %316 = vrot.lane.b32.xlu1 %v312_v1, %s703_s20 }
 0x1bb   : > { %v293_v2 = vpop.permute.xlu0 %292  ;;  %v291_v3 = vpop.permute.xlu1 %290 }
 0x1bc   : > { %v297_v4 = vadd.f32 %v293_v2, %v241_v35  ;;  %v296_v5 = vadd.f32 %v291_v3, %v240_v33 }
 0x1bf   : > { %v303_v6 = vpop.permute.xlu0 %302  ;;  %v301_v7 = vpop.permute.xlu1 %300 }
 0x1c0   : > { %v307_v8 = vadd.f32 %v303_v6, %v297_v4  ;;  %v306_v9 = vadd.f32 %v301_v7, %v296_v5 }
 0x1c2   : > { %v311_v10 = vand.u32 2147483647, %v307_v8  ;;  %v310_v11 = vand.u32 2147483647, %v306_v9 }
 0x1c3   : > { %v319_v12 = vpop.permute.xlu0 %318  ;;  %v317_v13 = vpop.permute.xlu1 %316 }
 0x1c4   : > { %v323_v14 = vadd.f32 %v319_v12, %v311_v10  ;;  %v322_v15 = vadd.f32 %v317_v13, %v310_v11 }
 0x1c6   : > { %328 = vrot.lane.b32.xlu0 %v323_v14, %s705_s6  ;;  %326 = vrot.lane.b32.xlu1 %v322_v15, %s705_s6 }
 0x238   : > { %v329_v16 = vpop.permute.xlu0 %328  ;;  %v327_v17 = vpop.permute.xlu1 %326 }
 0x239   : > { %v336_v18 = vsel %vm332_vm2, %v329_v16, 0.0  ;;  %v333_v19 = vsel %vm332_vm2, %v327_v17, 0.0 }
 0x23a   : > { %337 = vadd.xlane.f32.xlu0 %v336_v18  ;;  %334 = vadd.xlane.f32.xlu1 %v333_v19 }
 0x2c3   : > { %v338_v24 = vpop.xlane.xlu0 %337  ;;  %v335_v25 = vpop.xlane.xlu1 %334 }
 0x2c4   : > { %v371_v26 = vmul.f32 %v507_v23, %v338_v24  ;;  %v373_v27 = vsel %vm372_vm4, %v335_v25, 0.0 }
 0x2c6   : > { %v374_v28 = vsel %vm372_vm4, %v371_v26, 0.0 }
 0x2c7   : > { %v375_v29 = vadd.f32 %v374_v28, %v373_v27 }
 0x2c9   : > { %376 = vadd.xlane.f32.xlu0 %v375_v29 }
 0x352   : > { %v377_v30 = vpop.xlane.xlu0 %376 }
 0x353   : > { %v378_v31 = vrot.slane %v377_v30, 4 }
 0x355   : > { %v379_v32 = vadd.f32 %v378_v31, %v377_v30 }
 0x357   : > { %v380_v33 = vrot.slane %v379_v32, 2 }
 0x359   : > { %v381_v34 = vadd.f32 %v380_v33, %v379_v32 }
 0x35b   : > { %v382_v35 = vrot.slane %v381_v34, 1 }
 0x35d   : > { %v383_v36 = vadd.f32 %v382_v35, %v381_v34 }
 0x35f   : > { %514 = vpush %v383_v36 }
 0x390   : > { %s515_s26 = spop %514 }
 0x391   : > { %v385_v37 = vstv %s515_s26 }
 0x392   : > { %386 = vst [vmem:[%s201_s17] sm:$0xff] %v385_v37 }
 0x393   : > { %642 = shalt.err (!%p639_p4)
}
 0x394   : > { %s643_s19 = scalar_lea.hbm %s399_s25, 128  ;;  %s647_s29 = scalar_lea.hbm %s950_s2, 256 }
 0x395   : > { %p644_p9 = scmp.ne.s32.totalorder %s399_s25, %s643_s19  ;;  %p648_p5 = scmp.lt.s32.totalorder %s399_s25, %s950_s2 }
 0x396   : > { %p649_p8 = scmp.lt.s32.totalorder %s647_s29, %s643_s19 }
 0x397   : > { %p645_p11 = pnand %p644_p9, %p960_p1 }
 0x398   : > { %p650_p6 = por %p649_p8, %p648_p5 }
 0x399   : > { %p646_p3 = pneg %p645_p11 }
 0x39b   : > { %p651_p13 = pnand %p650_p6, %p646_p3 }
 0x39d   : > { %654 = shalt.err (!%p651_p13)
}
 0x39e   : > { %520 = dma.vmem_to_hbm [thread:$0]  (%p960_p1), %s908_s28, 128, %s399_s25, %s388_s7  }
 0x39f PF: > { %s413_s6 = sand.u32 1, %s685_s9   ;;  %p961_p12 = scmp.ne.s32.totalorder %s956_s22, 0 }
 0x3a0   : > { %p962_p7 = scmp.ge.s32.totalorder %s697_s12, 2  ;;  %s414_s14 = scalar_lea.sflag [#allocation4], %s413_s6 }
 0x3a2   : > { %p530_p10 = pnand %p962_p7, %p961_p12 }
 0x3a4   : > { %p531_p0 = pneg %p530_p10 }
 0x3a6   : > { %680 = dma.done.wait (%p531_p0), %s414_s14, 128  }
 0x3a7   : > { %682 = vsyncadd (%p531_p0), %s414_s14, 4294967168  ;;  %p18_p2 = scmp.ge.s32.totalorder %s748_s15, 4   ;;  %s963_s9 = smov %s689_s10 }
 0x3a8   : > { %s964_s10 = smov %s693_s11  ;;  %s965_s11 = smov %s760_s18 }
 0x3a9   : > { %s966_s12 = smov %s748_s15  ;;  %20 = sbr.rel (!%p18_p2) target bundleno = 7 (0x7), region = 86 }
 0x3ae   :  { %419 = vsyncpa [#allocation3], 1 }
 0x3af   :  { %421 = vsyncpa [#allocation3 + $0x1], 1 }
 0x3b0   :  { %422 = vsyncpa [#allocation6], 1 }
 0x3b1   :  { %424 = vsyncpa [#allocation6 + $0x1], 1 }
 0x3b2   :  { %425 = vsyncpa [#allocation4], 1 }
 0x3b3   :  { %427 = vsyncpa [#allocation4 + $0x1], 1 }

</bundles_post_ra>
